<compile_context>
chip_gen: v7x
topology: tpu7x:2x2x1
jax: 0.10.0
libtpu: 0.0.40
codegen_flags: <defaults>
</compile_context>

<pallas_src>
import functools

import jax
import jax.numpy as jnp
from jax.experimental import pallas as pl
from jax.experimental.pallas import tpu as pltpu

LANE = 128  # lane-dense padded width for all hidden/output dims


def mlp_kernel(x_ref, w1_ref, b1_ref, w2_ref, b2_ref, w3_ref, b3_ref,
               w4_ref, b4_ref, o_ref):
    # Layer 1: Linear(input_dim, 64 -> 128 padded) + ReLU
    x = x_ref[...].astype(jnp.bfloat16)
    h = jnp.dot(x, w1_ref[...], preferred_element_type=jnp.float32)
    h = jnp.maximum(h + b1_ref[...], 0.0)
    # Layer 2: Linear(64, 32) + ReLU (128x128 padded)
    h = jnp.dot(h.astype(jnp.bfloat16), w2_ref[...],
                preferred_element_type=jnp.float32)
    h = jnp.maximum(h + b2_ref[...], 0.0)
    # Layer 3: Linear(32, 16) + ReLU (128x128 padded)
    h = jnp.dot(h.astype(jnp.bfloat16), w3_ref[...],
                preferred_element_type=jnp.float32)
    h = jnp.maximum(h + b3_ref[...], 0.0)
    # Layer 4: Linear(16, output_dim) + Sigmoid (128x128 padded)
    z = jnp.dot(h.astype(jnp.bfloat16), w4_ref[...],
                preferred_element_type=jnp.float32)
    z = z + b4_ref[...]
    o_ref[...] = jax.nn.sigmoid(z).astype(o_ref.dtype)


def _pad_to(a, shape):
    pads = [(0, s - d) for d, s in zip(a.shape, shape)]
    return jnp.pad(a, pads)


@functools.partial(jax.jit, static_argnames=("tile_b",))
def mlp_forward(x, params, tile_b=1024):
    """x: (batch, in_dim) f32; params: 4 x (W (in,out) f32, b (1,out) f32)."""
    (w1, b1), (w2, b2), (w3, b3), (w4, b4) = params
    batch, in_dim = x.shape
    out_dim = w4.shape[1]
    h1, h2, h3 = w1.shape[1], w2.shape[1], w3.shape[1]

    # --- lane-dense padded, bf16 weights (zero padding keeps semantics exact:
    #     padded lanes carry 0 through matmul + zero bias + ReLU).
    w1p = _pad_to(w1, (in_dim, LANE)).astype(jnp.bfloat16)
    w2p = _pad_to(w2, (LANE, LANE)).astype(jnp.bfloat16)
    w3p = _pad_to(w3, (LANE, LANE)).astype(jnp.bfloat16)
    w4p = _pad_to(w4, (LANE, LANE)).astype(jnp.bfloat16)
    b1p = _pad_to(b1, (1, LANE)).astype(jnp.float32)
    b2p = _pad_to(b2, (1, LANE)).astype(jnp.float32)
    b3p = _pad_to(b3, (1, LANE)).astype(jnp.float32)
    b4p = _pad_to(b4, (1, LANE)).astype(jnp.float32)

    # --- batch tiling: multiple of 8 sublanes, capped at tile_b.
    #     VMEM per tile (double-buffered x + out) ~= 2 * tile_b*(in_dim+LANE)*4B
    #     -> ~1.3 MiB at tile_b=1024, in_dim=32: comfortably under 32 MiB scoped
    #     VMEM on v5e/v6e/v7x, with weights (~100 KiB bf16) resident.
    tile_b = min(tile_b, ((batch + 7) // 8) * 8)
    padded_batch = pl.cdiv(batch, tile_b) * tile_b
    if padded_batch != batch:
        x = jnp.pad(x, ((0, padded_batch - batch), (0, 0)))
    grid = (padded_batch // tile_b,)

    const2 = lambda i: (0, 0)
    in_specs = [
        pl.BlockSpec((tile_b, in_dim), lambda i: (i, 0)),   # x tile (pipelined)
        pl.BlockSpec((in_dim, LANE), const2),               # W1 (VMEM-resident)
        pl.BlockSpec((1, LANE), const2),                    # b1
        pl.BlockSpec((LANE, LANE), const2),                 # W2
        pl.BlockSpec((1, LANE), const2),                    # b2
        pl.BlockSpec((LANE, LANE), const2),                 # W3
        pl.BlockSpec((1, LANE), const2),                    # b3
        pl.BlockSpec((LANE, LANE), const2),                 # W4
        pl.BlockSpec((1, LANE), const2),                    # b4
    ]
    out_specs = pl.BlockSpec((tile_b, LANE), lambda i: (i, 0))

    flops = 2 * padded_batch * (in_dim * h1 + h1 * h2 + h2 * h3 + h3 * out_dim)
    bytes_accessed = (padded_batch * in_dim * 4          # x
                      + padded_batch * LANE * 4          # padded out
                      + (in_dim + 3 * LANE) * LANE * 2   # bf16 weights
                      + 4 * LANE * 4)                    # biases
    cost = pl.CostEstimate(flops=flops,
                           transcendentals=padded_batch * out_dim,
                           bytes_accessed=bytes_accessed)

    out_padded = pl.pallas_call(
        mlp_kernel,
        out_shape=jax.ShapeDtypeStruct((padded_batch, LANE), jnp.float32),
        grid=grid,
        in_specs=in_specs,
        out_specs=out_specs,
        compiler_params=pltpu.CompilerParams(
            dimension_semantics=("parallel",)),
        cost_estimate=cost,
    )(x, w1p, b1p, w2p, b2p, w3p, b3p, w4p, b4p)

    return out_padded[:batch, :out_dim]


def init_linear(key, in_dim, out_dim):
    # Deterministic init (roughly PyTorch's uniform(-1/sqrt(in), 1/sqrt(in)))
    kw, kb = jax.random.split(key)
    bound = 1.0 / jnp.sqrt(jnp.float32(in_dim))
    w = jax.random.uniform(kw, (in_dim, out_dim), jnp.float32, -bound, bound)
    b = jax.random.uniform(kb, (1, out_dim), jnp.float32, -bound, bound)
    return w, b


if __name__ == "__main__":
    input_dim = 32
    output_dim = 4
    batch = 8

    key = jax.random.PRNGKey(0)
    kx, k1, k2, k3, k4 = jax.random.split(key, 5)

    x = jax.random.normal(kx, (batch, input_dim), jnp.float32)
    params = (
        init_linear(k1, input_dim, 64),
        init_linear(k2, 64, 32),
        init_linear(k3, 32, 16),
        init_linear(k4, 16, output_dim),
    )

    out = mlp_forward(x, params)
    jax.block_until_ready(out)
    assert out.shape == (batch, output_dim)

    # Reference in plain JAX (same bf16 matmul operands, f32 accumulate).
    h = x
    for i, (w, b) in enumerate(params):
        z = jnp.dot(h.astype(jnp.bfloat16), w.astype(jnp.bfloat16),
                    preferred_element_type=jnp.float32) + b
        h = jnp.maximum(z, 0.0) if i < 3 else jax.nn.sigmoid(z)
    assert jnp.allclose(out, h, atol=2e-3, rtol=1e-3), "mismatch vs reference"

    print("KERNEL_OK")
</pallas_src>

<mosaic_0001>
module attributes {stable_mosaic.version = 11 : i64} {
  func.func @mlp_kernel(%arg0: i32, %arg1: memref<8x32xf32, #tpu.memory_space<vmem>>, %arg2: memref<32x128xbf16, #tpu.memory_space<vmem>>, %arg3: memref<1x128xf32, #tpu.memory_space<vmem>>, %arg4: memref<128x128xbf16, #tpu.memory_space<vmem>>, %arg5: memref<1x128xf32, #tpu.memory_space<vmem>>, %arg6: memref<128x128xbf16, #tpu.memory_space<vmem>>, %arg7: memref<1x128xf32, #tpu.memory_space<vmem>>, %arg8: memref<128x128xbf16, #tpu.memory_space<vmem>>, %arg9: memref<1x128xf32, #tpu.memory_space<vmem>>, %arg10: memref<8x128xf32, #tpu.memory_space<vmem>>) attributes {dimension_semantics = [#tpu.dimension_semantics<parallel>], iteration_bounds = array<i64: 1>, scalar_prefetch = 0 : i64, scratch_operands = 0 : i64, tpu.core_type = #tpu.core_type<tc>, window_params = [{transform_indices = @transform_0, window_bounds = array<i64: 8, 32>}, {pipeline_mode = #tpu.pipeline_mode<synchronous>, transform_indices = @transform_1, window_bounds = array<i64: 32, 128>}, {pipeline_mode = #tpu.pipeline_mode<synchronous>, transform_indices = @transform_2, window_bounds = array<i64: 1, 128>}, {pipeline_mode = #tpu.pipeline_mode<synchronous>, transform_indices = @transform_3, window_bounds = array<i64: 128, 128>}, {pipeline_mode = #tpu.pipeline_mode<synchronous>, transform_indices = @transform_4, window_bounds = array<i64: 1, 128>}, {pipeline_mode = #tpu.pipeline_mode<synchronous>, transform_indices = @transform_5, window_bounds = array<i64: 128, 128>}, {pipeline_mode = #tpu.pipeline_mode<synchronous>, transform_indices = @transform_6, window_bounds = array<i64: 1, 128>}, {pipeline_mode = #tpu.pipeline_mode<synchronous>, transform_indices = @transform_7, window_bounds = array<i64: 128, 128>}, {pipeline_mode = #tpu.pipeline_mode<synchronous>, transform_indices = @transform_8, window_bounds = array<i64: 1, 128>}, {transform_indices = @transform_9, window_bounds = array<i64: 8, 128>}]} {
    %c0 = arith.constant 0 : index
    %c0_0 = arith.constant 0 : index
    %0 = vector.load %arg1[%c0, %c0_0] : memref<8x32xf32, #tpu.memory_space<vmem>>, vector<8x32xf32>
    %1 = arith.truncf %0 : vector<8x32xf32> to vector<8x32xbf16>
    %c0_1 = arith.constant 0 : index
    %c0_2 = arith.constant 0 : index
    %2 = vector.load %arg2[%c0_1, %c0_2] : memref<32x128xbf16, #tpu.memory_space<vmem>>, vector<32x128xbf16>
    %cst = arith.constant dense<0.000000e+00> : vector<8x128xf32>
    %3 = tpu.matmul %1, %2, %cst {dimension_numbers = #tpu.dot_dimension_numbers<[1], [0], [0], [1], [0, 0, 1, 1], [], []>} : vector<8x32xbf16>, vector<32x128xbf16>, vector<8x128xf32> -> vector<8x128xf32>
    %c0_3 = arith.constant 0 : index
    %c0_4 = arith.constant 0 : index
    %4 = vector.load %arg3[%c0_3, %c0_4] : memref<1x128xf32, #tpu.memory_space<vmem>>, vector<1x128xf32>
    %5 = vector.broadcast %4 : vector<1x128xf32> to vector<8x128xf32>
    %6 = arith.addf %3, %5 : vector<8x128xf32>
    %cst_5 = arith.constant 0.000000e+00 : f32
    %7 = vector.broadcast %cst_5 : f32 to vector<8x128xf32>
    %8 = arith.maximumf %6, %7 : vector<8x128xf32>
    %9 = arith.truncf %8 : vector<8x128xf32> to vector<8x128xbf16>
    %c0_6 = arith.constant 0 : index
    %c0_7 = arith.constant 0 : index
    %10 = vector.load %arg4[%c0_6, %c0_7] : memref<128x128xbf16, #tpu.memory_space<vmem>>, vector<128x128xbf16>
    %cst_8 = arith.constant dense<0.000000e+00> : vector<8x128xf32>
    %11 = tpu.matmul %9, %10, %cst_8 {dimension_numbers = #tpu.dot_dimension_numbers<[1], [0], [0], [1], [0, 0, 1, 1], [], []>} : vector<8x128xbf16>, vector<128x128xbf16>, vector<8x128xf32> -> vector<8x128xf32>
    %c0_9 = arith.constant 0 : index
    %c0_10 = arith.constant 0 : index
    %12 = vector.load %arg5[%c0_9, %c0_10] : memref<1x128xf32, #tpu.memory_space<vmem>>, vector<1x128xf32>
    %13 = vector.broadcast %12 : vector<1x128xf32> to vector<8x128xf32>
    %14 = arith.addf %11, %13 : vector<8x128xf32>
    %cst_11 = arith.constant 0.000000e+00 : f32
    %15 = vector.broadcast %cst_11 : f32 to vector<8x128xf32>
    %16 = arith.maximumf %14, %15 : vector<8x128xf32>
    %17 = arith.truncf %16 : vector<8x128xf32> to vector<8x128xbf16>
    %c0_12 = arith.constant 0 : index
    %c0_13 = arith.constant 0 : index
    %18 = vector.load %arg6[%c0_12, %c0_13] : memref<128x128xbf16, #tpu.memory_space<vmem>>, vector<128x128xbf16>
    %cst_14 = arith.constant dense<0.000000e+00> : vector<8x128xf32>
    %19 = tpu.matmul %17, %18, %cst_14 {dimension_numbers = #tpu.dot_dimension_numbers<[1], [0], [0], [1], [0, 0, 1, 1], [], []>} : vector<8x128xbf16>, vector<128x128xbf16>, vector<8x128xf32> -> vector<8x128xf32>
    %c0_15 = arith.constant 0 : index
    %c0_16 = arith.constant 0 : index
    %20 = vector.load %arg7[%c0_15, %c0_16] : memref<1x128xf32, #tpu.memory_space<vmem>>, vector<1x128xf32>
    %21 = vector.broadcast %20 : vector<1x128xf32> to vector<8x128xf32>
    %22 = arith.addf %19, %21 : vector<8x128xf32>
    %cst_17 = arith.constant 0.000000e+00 : f32
    %23 = vector.broadcast %cst_17 : f32 to vector<8x128xf32>
    %24 = arith.maximumf %22, %23 : vector<8x128xf32>
    %25 = arith.truncf %24 : vector<8x128xf32> to vector<8x128xbf16>
    %c0_18 = arith.constant 0 : index
    %c0_19 = arith.constant 0 : index
    %26 = vector.load %arg8[%c0_18, %c0_19] : memref<128x128xbf16, #tpu.memory_space<vmem>>, vector<128x128xbf16>
    %cst_20 = arith.constant dense<0.000000e+00> : vector<8x128xf32>
    %27 = tpu.matmul %25, %26, %cst_20 {dimension_numbers = #tpu.dot_dimension_numbers<[1], [0], [0], [1], [0, 0, 1, 1], [], []>} : vector<8x128xbf16>, vector<128x128xbf16>, vector<8x128xf32> -> vector<8x128xf32>
    %c0_21 = arith.constant 0 : index
    %c0_22 = arith.constant 0 : index
    %28 = vector.load %arg9[%c0_21, %c0_22] : memref<1x128xf32, #tpu.memory_space<vmem>>, vector<1x128xf32>
    %29 = vector.broadcast %28 : vector<1x128xf32> to vector<8x128xf32>
    %30 = arith.addf %27, %29 : vector<8x128xf32>
    %31 = arith.negf %30 : vector<8x128xf32>
    %32 = math.exp %31 : vector<8x128xf32>
    %cst_23 = arith.constant 1.000000e+00 : f32
    %33 = vector.broadcast %cst_23 : f32 to vector<8x128xf32>
    %34 = arith.addf %33, %32 : vector<8x128xf32>
    %35 = arith.divf %33, %34 : vector<8x128xf32>
    %c0_24 = arith.constant 0 : index
    %c0_25 = arith.constant 0 : index
    %36 = vector.load %arg10[%c0_24, %c0_25] : memref<8x128xf32, #tpu.memory_space<vmem>>, vector<8x128xf32>
    tpu.vector_store %arg10[%c0_24, %c0_25], %35 {strides = array<i32>} : memref<8x128xf32, #tpu.memory_space<vmem>>, vector<8x128xf32>,
    return
  }
  func.func @transform_0(%arg0: i32) -> (i32, i32) {
    %c0_i32 = arith.constant 0 : i32
    %c0_i32_0 = arith.constant 0 : i32
    return %arg0, %c0_i32 : i32, i32
  }
  func.func @transform_1(%arg0: i32) -> (i32, i32) {
    %c0_i32 = arith.constant 0 : i32
    %c0_i32_0 = arith.constant 0 : i32
    %c0_i32_1 = arith.constant 0 : i32
    return %c0_i32, %c0_i32_0 : i32, i32
  }
  func.func @transform_2(%arg0: i32) -> (i32, i32) {
    %c0_i32 = arith.constant 0 : i32
    %c0_i32_0 = arith.constant 0 : i32
    %c0_i32_1 = arith.constant 0 : i32
    return %c0_i32, %c0_i32_0 : i32, i32
  }
  func.func @transform_3(%arg0: i32) -> (i32, i32) {
    %c0_i32 = arith.constant 0 : i32
    %c0_i32_0 = arith.constant 0 : i32
    %c0_i32_1 = arith.constant 0 : i32
    return %c0_i32, %c0_i32_0 : i32, i32
  }
  func.func @transform_4(%arg0: i32) -> (i32, i32) {
    %c0_i32 = arith.constant 0 : i32
    %c0_i32_0 = arith.constant 0 : i32
    %c0_i32_1 = arith.constant 0 : i32
    return %c0_i32, %c0_i32_0 : i32, i32
  }
  func.func @transform_5(%arg0: i32) -> (i32, i32) {
    %c0_i32 = arith.constant 0 : i32
    %c0_i32_0 = arith.constant 0 : i32
    %c0_i32_1 = arith.constant 0 : i32
    return %c0_i32, %c0_i32_0 : i32, i32
  }
  func.func @transform_6(%arg0: i32) -> (i32, i32) {
    %c0_i32 = arith.constant 0 : i32
    %c0_i32_0 = arith.constant 0 : i32
    %c0_i32_1 = arith.constant 0 : i32
    return %c0_i32, %c0_i32_0 : i32, i32
  }
  func.func @transform_7(%arg0: i32) -> (i32, i32) {
    %c0_i32 = arith.constant 0 : i32
    %c0_i32_0 = arith.constant 0 : i32
    %c0_i32_1 = arith.constant 0 : i32
    return %c0_i32, %c0_i32_0 : i32, i32
  }
  func.func @transform_8(%arg0: i32) -> (i32, i32) {
    %c0_i32 = arith.constant 0 : i32
    %c0_i32_0 = arith.constant 0 : i32
    %c0_i32_1 = arith.constant 0 : i32
    return %c0_i32, %c0_i32_0 : i32, i32
  }
  func.func @transform_9(%arg0: i32) -> (i32, i32) {
    %c0_i32 = arith.constant 0 : i32
    %c0_i32_0 = arith.constant 0 : i32
    return %arg0, %c0_i32 : i32, i32
  }
}

</mosaic_0001>

<bundles_post_ra>
// kernel: mlp_forward.1
= control target key start
LH: loop header
LB: loop body
LE: loop exit
PB: predicated region body
PF: predicated region fallthrough
CT: control target
= control target key end

     0   :  { %v614_v0 = vmov 0.0   ;;  %vm615_vm0 = vmmov 0   ;;  %vm58_vm1 = vcmask 261120   ;;  %s796_s1 = inlined_call_operand.vmem [shape: bf16[32,128], index: 1, kind: input, shape index: {}]   ;;  %s797_s0 = inlined_call_operand.vmem [shape: f32[8,32], index: 0, kind: input, shape index: {}]   ;;  %s798_s3 = inlined_call_operand.vmem [shape: bf16[128,128], index: 3, kind: input, shape index: {}]   ;;  %s799_s5 = inlined_call_operand.vmem [shape: bf16[128,128], index: 5, kind: input, shape index: {}]   ;;  %s800_s2 = inlined_call_operand.vmem [shape: f32[1,128], index: 2, kind: input, shape index: {}]   ;;  %s801_s7 = inlined_call_operand.vmem [shape: bf16[128,128], index: 7, kind: input, shape index: {}]   ;;  %s802_s4 = inlined_call_operand.vmem [shape: f32[1,128], index: 4, kind: input, shape index: {}]   ;;  %s803_s6 = inlined_call_operand.vmem [shape: f32[1,128], index: 6, kind: input, shape index: {}]   ;;  %s804_s8 = inlined_call_operand.vmem [shape: f32[1,128], index: 8, kind: input, shape index: {}]   ;;  %s805_s9 = inlined_call_operand.vmem [shape: f32[8,128], index: 9, kind: output, shape index: {}]  }
   0x1   :  { %514 = vmatprep.subr.bf16.mxu0 %v614_v0  ;;  %v584_v1 = vld [vmem:[%s796_s1] sm:$0xff]   ;;  %518 = vmatprep.mubr.msk.bf16.mxu0 %vm615_vm0, %v614_v0  ;;  %v585_v2 = vld [vmem:[%s796_s1 + $0x8] sm:$0xff]   ;;  %v588_v7 = vld [vmem:[%s798_s3 + $0x10] sm:$0xff]  }
   0x2   :  { %522 = vmatprep.subr.bf16.mxu1 %v614_v0  ;;  %538 = vmatprep.mubr.msk.bf16.mxu1 %vm615_vm0, %v614_v0  ;;  %v33_v3 = vld [vmem:[%s797_s0] sm:$0xff]  ;;  %v587_v6 = vld [vmem:[%s798_s3 + $0x8] sm:$0xff]   ;;  %v589_v8 = vld [vmem:[%s798_s3 + $0x18] sm:$0xff]  }
   0x3   :  { %515 = vmatpush3.bf16.msra.mxu0 %v584_v1  ;;  %v586_v4 = vld [vmem:[%s798_s3] sm:$0xff]   ;;  %v34_v5 = vpack.c.bf16 %v33_v3, %v33_v3  ;;  %v591_v10 = vld [vmem:[%s798_s3 + $0x28] sm:$0xff]   ;;  %v592_v11 = vld [vmem:[%s798_s3 + $0x30] sm:$0xff]  }
   0x4   :  { %516 = vmatprep.subr.bf16.mxu0 %v614_v0  ;;  %523 = vmatpush3.bf16.msra.mxu1 %v586_v4  ;;  %v590_v9 = vld [vmem:[%s798_s3 + $0x20] sm:$0xff]   ;;  %v593_v12 = vld [vmem:[%s798_s3 + $0x38] sm:$0xff]   ;;  %v595_v14 = vld [vmem:[%s799_s5 + $0x8] sm:$0xff]  }
   0x5   :  { %524 = vmatprep.subr.bf16.mxu1 %v614_v0  ;;  %v594_v13 = vld [vmem:[%s799_s5] sm:$0xff]   ;;  %v596_v15 = vld [vmem:[%s799_s5 + $0x10] sm:$0xff]   ;;  %v597_v16 = vld [vmem:[%s799_s5 + $0x18] sm:$0xff]  }
   0x6   :  { %v598_v17 = vld [vmem:[%s799_s5 + $0x20] sm:$0xff]   ;;  %v599_v18 = vld [vmem:[%s799_s5 + $0x28] sm:$0xff]   ;;  %v600_v27 = vld [vmem:[%s799_s5 + $0x30] sm:$0xff]  }
   0x7   :  { %517 = vmatpush3.bf16.msra.mxu0 %v585_v2  ;;  %v452_v19 = vld [vmem:[%s800_s2] ss:$0 sm:$0xff]  ;;  %v601_v28 = vld [vmem:[%s799_s5 + $0x38] sm:$0xff]   ;;  %v603_v30 = vld [vmem:[%s801_s7 + $0x8] sm:$0xff]  }
   0x8   :  { %542 = vmatprep.subr.bf16.mxu0 %v614_v0  ;;  %525 = vmatpush3.bf16.msra.mxu1 %v587_v6  ;;  %v602_v29 = vld [vmem:[%s801_s7] sm:$0xff]   ;;  %v604_v31 = vld [vmem:[%s801_s7 + $0x10] sm:$0xff]   ;;  %v605_v32 = vld [vmem:[%s801_s7 + $0x18] sm:$0xff]  }
   0x9   :  { %526 = vmatprep.subr.bf16.mxu1 %v614_v0  ;;  %v606_v33 = vld [vmem:[%s801_s7 + $0x20] sm:$0xff]   ;;  %v607_v34 = vld [vmem:[%s801_s7 + $0x28] sm:$0xff]   ;;  %v608_v43 = vld [vmem:[%s801_s7 + $0x30] sm:$0xff]  }
   0xa   :  { %519 = vmatmul.mubr.msk.bf16.vlgmr.msra.gmra.mrb[0].mxu0 %vm58_vm1, %v34_v5  ;;  %v456_v35 = vld [vmem:[%s802_s4] ss:$0 sm:$0xff]  ;;  %v609_v44 = vld [vmem:[%s801_s7 + $0x38] sm:$0xff]  }
   0xb   :  { %558 = vmatprep.mubr.msk.bf16.mxu0 %vm615_vm0, %v614_v0  ;;  %543 = vmatpush3.bf16.msra.mxu0 %v594_v13  ;;  %v465_v45 = vld [vmem:[%s803_s6] ss:$0 sm:$0xff] }
   0xc   :  { %527 = vmatpush3.bf16.msra.mxu1 %v588_v7  ;;  %544 = vmatprep.subr.bf16.mxu0 %v614_v0  ;;  %v474_v53 = vld [vmem:[%s804_s8] ss:$0 sm:$0xff] }
   0xd   :  { %528 = vmatprep.subr.bf16.mxu1 %v614_v0 }
   0xf   :  { %545 = vmatpush3.bf16.msra.mxu0 %v595_v14 }
  0x10   :  { %529 = vmatpush3.bf16.msra.mxu1 %v589_v8  ;;  %546 = vmatprep.subr.bf16.mxu0 %v614_v0 }
  0x11   :  { %530 = vmatprep.subr.bf16.mxu1 %v614_v0 }
  0x13   :  { %547 = vmatpush3.bf16.msra.mxu0 %v596_v15 }
  0x14   :  { %531 = vmatpush3.bf16.msra.mxu1 %v590_v9  ;;  %548 = vmatprep.subr.bf16.mxu0 %v614_v0 }
  0x15   :  { %532 = vmatprep.subr.bf16.mxu1 %v614_v0 }
  0x17   :  { %549 = vmatpush3.bf16.msra.mxu0 %v597_v16 }
  0x18   :  { %533 = vmatpush3.bf16.msra.mxu1 %v591_v10  ;;  %550 = vmatprep.subr.bf16.mxu0 %v614_v0 }
  0x19   :  { %534 = vmatprep.subr.bf16.mxu1 %v614_v0 }
  0x1b   :  { %551 = vmatpush3.bf16.msra.mxu0 %v598_v17 }
  0x1c   :  { %535 = vmatpush3.bf16.msra.mxu1 %v592_v11  ;;  %552 = vmatprep.subr.bf16.mxu0 %v614_v0 }
  0x1d   :  { %536 = vmatprep.subr.bf16.mxu1 %v614_v0 }
  0x1f   :  { %553 = vmatpush3.bf16.msra.mxu0 %v599_v18 }
  0x20   :  { %537 = vmatpush3.bf16.msra.mxu1 %v593_v12  ;;  %554 = vmatprep.subr.bf16.mxu0 %v614_v0 }
  0x21   :  { %562 = vmatprep.subr.bf16.mxu1 %v614_v0 }
  0x23   :  { %555 = vmatpush3.bf16.msra.mxu0 %v600_v27 }
  0x24   :  { %556 = vmatprep.subr.bf16.mxu0 %v614_v0 }
  0x27   :  { %557 = vmatpush3.bf16.msra.mxu0 %v601_v28 }
  0xdd   :  { %v96_v20 = vpop.f32.mrb[0].mxu0 }
  0xde   :  { %v97_v21 = vadd.f32 %v452_v19, %v96_v20  ;;  %v520_v22 = vpop.f32.mrb[1].mxu0 }
  0xdf   :  { %v99_v23 = vpop.f32.mrb[2].mxu0 }
  0xe0   :  { %v102_v24 = vmax.f32 %v97_v21, 0.0  ;;  %v521_v25 = vpop.f32.mrb[3].mxu0 }
  0xe2   :  { %v103_v26 = vpack.c.bf16 %v102_v24, %v102_v24 }
  0xe4   :  { %539 = vmatmul.mubr.bf16.vlgmr.msra.gmra.mrb[0].mxu1 %v103_v26 }
  0xe5   :  { %578 = vmatprep.mubr.msk.bf16.mxu1 %vm615_vm0, %v614_v0  ;;  %563 = vmatpush3.bf16.msra.mxu1 %v602_v29 }
  0xe6   :  { %564 = vmatprep.subr.bf16.mxu1 %v614_v0 }
  0xe9   :  { %565 = vmatpush3.bf16.msra.mxu1 %v603_v30 }
  0xea   :  { %566 = vmatprep.subr.bf16.mxu1 %v614_v0 }
  0xed   :  { %567 = vmatpush3.bf16.msra.mxu1 %v604_v31 }
  0xee   :  { %568 = vmatprep.subr.bf16.mxu1 %v614_v0 }
  0xf1   :  { %569 = vmatpush3.bf16.msra.mxu1 %v605_v32 }
  0xf2   :  { %570 = vmatprep.subr.bf16.mxu1 %v614_v0 }
  0xf5   :  { %571 = vmatpush3.bf16.msra.mxu1 %v606_v33 }
  0xf6   :  { %572 = vmatprep.subr.bf16.mxu1 %v614_v0 }
  0xf9   :  { %573 = vmatpush3.bf16.msra.mxu1 %v607_v34 }
  0xfa   :  { %574 = vmatprep.subr.bf16.mxu1 %v614_v0 }
  0xfd   :  { %575 = vmatpush3.bf16.msra.mxu1 %v608_v43 }
  0xfe   :  { %576 = vmatprep.subr.bf16.mxu1 %v614_v0 }
 0x101   :  { %577 = vmatpush3.bf16.msra.mxu1 %v609_v44 }
 0x1b7   :  { %v209_v36 = vpop.f32.mrb[0].mxu1 }
 0x1b8   :  { %v210_v37 = vadd.f32 %v456_v35, %v209_v36  ;;  %v540_v38 = vpop.f32.mrb[1].mxu1 }
 0x1b9   :  { %v212_v39 = vpop.f32.mrb[2].mxu1 }
 0x1ba   :  { %v215_v40 = vmax.f32 %v210_v37, 0.0  ;;  %v541_v41 = vpop.f32.mrb[3].mxu1 }
 0x1bc   :  { %v216_v42 = vpack.c.bf16 %v215_v40, %v215_v40 }
 0x1be   :  { %559 = vmatmul.mubr.bf16.vlgmr.msra.gmra.mrb[4].mxu0 %v216_v42 }
 0x291   :  { %v322_v46 = vpop.f32.mrb[4].mxu0 }
 0x292   :  { %v323_v47 = vadd.f32 %v465_v45, %v322_v46  ;;  %v560_v48 = vpop.f32.mrb[5].mxu0 }
 0x293   :  { %v325_v49 = vpop.f32.mrb[6].mxu0 }
 0x294   :  { %v328_v50 = vmax.f32 %v323_v47, 0.0  ;;  %v561_v51 = vpop.f32.mrb[7].mxu0 }
 0x296   :  { %v329_v52 = vpack.c.bf16 %v328_v50, %v328_v50 }
 0x298   :  { %579 = vmatmul.mubr.bf16.vlgmr.msra.gmra.mrb[4].mxu1 %v329_v52 }
 0x36b   :  { %v435_v54 = vpop.f32.mrb[4].mxu1 }
 0x36c   :  { %v436_v55 = vadd.f32 %v474_v53, %v435_v54  ;;  %v580_v56 = vpop.f32.mrb[5].mxu1 }
 0x36d   :  { %v438_v57 = vpop.f32.mrb[6].mxu1 }
 0x36e   :  { %v483_v58 = vmul.f32 -1.442695, %v436_v55  ;;  %v581_v59 = vpop.f32.mrb[7].mxu1 }
 0x370   :  { %610 = vpow2.f32 %v483_v58 }
 0x37a   :  { %v611_v60 = vpop.eup %610 }
 0x37b   :  { %v444_v61 = vadd.f32 1.0, %v611_v60 }
 0x37d   :  { %612 = vrcp.f32 %v444_v61 }
 0x387   :  { %v613_v62 = vpop.eup %612 }
 0x388   :  { %447 = vst [vmem:[%s805_s9] sm:$0xff] %v613_v62 }

</bundles_post_ra>
